<compile_context>
chip_gen: v7x
topology: tpu7x:2x2x1
jax: 0.10.0
libtpu: 0.0.40
codegen_flags: <defaults>
</compile_context>

<pallas_src>
import functools

import jax
import jax.numpy as jnp
from jax.experimental import pallas as pl
from jax.experimental.pallas import tpu as pltpu


def channel_attention_kernel(x_ref, w1_ref, w2_ref, o_ref, *, use_mxu):
    # x_ref:  (TB, C, L)  current batch block
    # use_mxu=True : w1_ref = W1.T (C, H), w2_ref = W2.T (H, C)
    # use_mxu=False: w1_ref = W1   (H, C), w2_ref = W2   (C, H)
    xv = x_ref[...]                                   # (TB, C, L)
    tb = xv.shape[0]

    # Adaptive avg / max pool over L -> 2D (TB, C) per-channel scalars.
    avg_c = jnp.mean(xv, axis=-1)                     # (TB, C)
    max_c = jnp.max(xv, axis=-1)                      # (TB, C)

    # Fused MLP: stack avg & max -> run fc1/ReLU/fc2 once on (2*TB, C).
    pooled = jnp.concatenate([avg_c, max_c], axis=0)  # (2*TB, C)

    if use_mxu:
        h = jnp.dot(pooled, w1_ref[...],
                    preferred_element_type=jnp.float32)        # (2*TB, H)
        h = jnp.maximum(h, 0.0)
        out = jnp.dot(h, w2_ref[...],
                      preferred_element_type=jnp.float32)      # (2*TB, C)
    else:
        w1 = w1_ref[...]                                       # (H, C)
        w2 = w2_ref[...]                                       # (C, H)
        h = jnp.sum(pooled[:, None, :] * w1[None, :, :], axis=-1)   # (2*TB, H)
        h = jnp.maximum(h, 0.0)
        out = jnp.sum(h[:, None, :] * w2[None, :, :], axis=-1)      # (2*TB, C)

    gate = jax.nn.sigmoid(out[:tb] + out[tb:])        # (TB, C)  avg-path + max-path
    o_ref[...] = (gate[:, :, None] * xv).astype(o_ref.dtype)


def _choose_tb(B, C, L, itemsize, max_block_bytes):
    """Largest TB dividing B with TB*C*L*itemsize <= budget; keep grid >= 2 if possible."""
    per_batch = max(C * L * itemsize, 1)
    tb = max(1, min(B, max_block_bytes // per_batch))
    while B % tb != 0:
        tb -= 1
    # Prefer at least 2 grid steps so both v7x TensorCores get work.
    if B // tb < 2 and B >= 2:
        tb = max(d for d in range(1, B // 2 + 1) if B % d == 0)
    return tb


def channel_attention(x, w1, w2, *, max_block_bytes=2 << 20):
    """x: (B, C, L), w1: (H, C), w2: (C, H) -> (B, C, L)."""
    B, C, L = x.shape
    H = w1.shape[0]

    tb = _choose_tb(B, C, L, x.dtype.itemsize, max_block_bytes)
    grid_b = B // tb

    # MXU only pays off for reasonably large channel counts; otherwise the
    # contraction stays on the VPU/XLU (tiny C/H would be mostly MXU padding).
    use_mxu = (C >= 128) and (H >= 8)
    w1_arg = jnp.transpose(w1) if use_mxu else w1     # (C, H) or (H, C)
    w2_arg = jnp.transpose(w2) if use_mxu else w2     # (H, C) or (C, H)

    kernel = functools.partial(channel_attention_kernel, use_mxu=use_mxu)

    return pl.pallas_call(
        kernel,
        out_shape=jax.ShapeDtypeStruct((B, C, L), x.dtype),
        grid_spec=pltpu.PrefetchScalarGridSpec(
            num_scalar_prefetch=0,
            grid=(grid_b,),
            in_specs=[
                pl.BlockSpec((tb, C, L), lambda b: (b, 0, 0)),
                pl.BlockSpec(w1_arg.shape, lambda b: (0, 0)),
                pl.BlockSpec(w2_arg.shape, lambda b: (0, 0)),
            ],
            out_specs=pl.BlockSpec((tb, C, L), lambda b: (b, 0, 0)),
        ),
        compiler_params=pltpu.CompilerParams(
            dimension_semantics=("parallel",)),
    )(x, w1_arg, w2_arg)


def channel_attention_ref(x, w1, w2):
    """Pure-JAX reference reproducing the PyTorch forward."""
    avg = jnp.mean(x, axis=-1, keepdims=True)            # (B, C, 1)
    mx = jnp.max(x, axis=-1, keepdims=True)              # (B, C, 1)

    def mlp(p):                                          # p: (B, C, 1)
        h = jnp.einsum("hc,bcl->bhl", w1, p)             # fc1
        h = jnp.maximum(h, 0.0)
        return jnp.einsum("ch,bhl->bcl", w2, h)          # fc2

    gate = jax.nn.sigmoid(mlp(avg) + mlp(mx))            # (B, C, 1)
    return gate * x


def _run_case(key, B, C, L, ratio):
    H = max(C // ratio, 1)
    kx, k1, k2 = jax.random.split(key, 3)
    x = jax.random.normal(kx, (B, C, L), dtype=jnp.float32)
    # Conv1d(C, H, 1, bias=False) weight: (H, C, 1) -> (H, C)
    w1 = jax.random.normal(k1, (H, C), dtype=jnp.float32) * 0.1
    # Conv1d(H, C, 1, bias=False) weight: (C, H, 1) -> (C, H)
    w2 = jax.random.normal(k2, (C, H), dtype=jnp.float32) * 0.1

    out = jax.block_until_ready(channel_attention(x, w1, w2))
    ref = channel_attention_ref(x, w1, w2)
    assert out.shape == (B, C, L)
    assert jnp.allclose(out, ref, atol=1e-5, rtol=1e-5), (
        f"mismatch vs reference for B={B}, C={C}, L={L}, ratio={ratio}")


if __name__ == "__main__":
    key = jax.random.PRNGKey(0)
    k0, k1, k2 = jax.random.split(key, 3)

    # Module config from the spec: in_planes=32, ratio=16 -> hidden = 2 (VPU path).
    _run_case(k0, B=2, C=32, L=16, ratio=16)
    # Batch-blocked path: TB > 1 with >= 2 grid steps.
    _run_case(k1, B=8, C=32, L=16, ratio=16)
    # Larger channel count -> MXU path for fc1/fc2.
    _run_case(k2, B=2, C=128, L=16, ratio=16)

    print("KERNEL_OK")
</pallas_src>

<mosaic_0001>
module attributes {stable_mosaic.version = 11 : i64} {
  func.func @channel_attention_kernel(%arg0: i32, %arg1: memref<1x32x16xf32, #tpu.memory_space<vmem>>, %arg2: memref<2x32xf32, #tpu.memory_space<vmem>>, %arg3: memref<32x2xf32, #tpu.memory_space<vmem>>, %arg4: memref<1x32x16xf32, #tpu.memory_space<vmem>>) attributes {dimension_semantics = [#tpu.dimension_semantics<parallel>], iteration_bounds = array<i64: 2>, scalar_prefetch = 0 : i64, scratch_operands = 0 : i64, tpu.core_type = #tpu.core_type<tc>, window_params = [{transform_indices = @transform_0, window_bounds = array<i64: 1, 32, 16>}, {pipeline_mode = #tpu.pipeline_mode<synchronous>, transform_indices = @transform_1, window_bounds = array<i64: 2, 32>}, {pipeline_mode = #tpu.pipeline_mode<synchronous>, transform_indices = @transform_2, window_bounds = array<i64: 32, 2>}, {transform_indices = @transform_3, window_bounds = array<i64: 1, 32, 16>}]} {
    %c0 = arith.constant 0 : index
    %c0_0 = arith.constant 0 : index
    %c0_1 = arith.constant 0 : index
    %0 = vector.load %arg1[%c0, %c0_0, %c0_1] : memref<1x32x16xf32, #tpu.memory_space<vmem>>, vector<1x32x16xf32>
    %cst = arith.constant dense<0.000000e+00> : vector<1x32xf32>
    %1 = vector.multi_reduction <add>, %0, %cst [2] : vector<1x32x16xf32> to vector<1x32xf32>
    %cst_2 = arith.constant 1.600000e+01 : f32
    %2 = vector.broadcast %cst_2 : f32 to vector<1x32xf32>
    %3 = arith.divf %1, %2 : vector<1x32xf32>
    %cst_3 = arith.constant dense<0xFF800000> : vector<1x32xf32>
    %4 = vector.multi_reduction <maximumf>, %0, %cst_3 [2] : vector<1x32x16xf32> to vector<1x32xf32>
    %5 = tpu.concatenate %3, %4 in 0 : vector<1x32xf32>, vector<1x32xf32> -> vector<2x32xf32>
    %c0_4 = arith.constant 0 : index
    %c0_5 = arith.constant 0 : index
    %6 = vector.load %arg2[%c0_4, %c0_5] : memref<2x32xf32, #tpu.memory_space<vmem>>, vector<2x32xf32>
    %c0_6 = arith.constant 0 : index
    %c0_7 = arith.constant 0 : index
    %7 = vector.load %arg3[%c0_6, %c0_7] : memref<32x2xf32, #tpu.memory_space<vmem>>, vector<32x2xf32>
    %8 = vector.shape_cast %5 : vector<2x32xf32> to vector<2x1x32xf32>
    %9 = vector.shape_cast %6 : vector<2x32xf32> to vector<1x2x32xf32>
    %10 = vector.broadcast %8 : vector<2x1x32xf32> to vector<2x2x32xf32>
    %11 = vector.broadcast %9 : vector<1x2x32xf32> to vector<2x2x32xf32>
    %12 = arith.mulf %10, %11 : vector<2x2x32xf32>
    %cst_8 = arith.constant dense<0.000000e+00> : vector<2x2xf32>
    %13 = vector.multi_reduction <add>, %12, %cst_8 [2] : vector<2x2x32xf32> to vector<2x2xf32>
    %cst_9 = arith.constant 0.000000e+00 : f32
    %14 = vector.broadcast %cst_9 : f32 to vector<2x2xf32>
    %15 = arith.maximumf %13, %14 : vector<2x2xf32>
    %16 = vector.shape_cast %15 : vector<2x2xf32> to vector<2x1x2xf32>
    %17 = vector.shape_cast %7 : vector<32x2xf32> to vector<1x32x2xf32>
    %18 = vector.broadcast %16 : vector<2x1x2xf32> to vector<2x32x2xf32>
    %19 = vector.broadcast %17 : vector<1x32x2xf32> to vector<2x32x2xf32>
    %20 = arith.mulf %18, %19 : vector<2x32x2xf32>
    %cst_10 = arith.constant dense<0.000000e+00> : vector<2x32xf32>
    %21 = vector.multi_reduction <add>, %20, %cst_10 [2] : vector<2x32x2xf32> to vector<2x32xf32>
    %22 = vector.extract_strided_slice %21 {offsets = [0, 0], sizes = [1, 32], strides = [1, 1]} : vector<2x32xf32> to vector<1x32xf32>
    %23 = vector.extract_strided_slice %21 {offsets = [1, 0], sizes = [1, 32], strides = [1, 1]} : vector<2x32xf32> to vector<1x32xf32>
    %24 = arith.addf %22, %23 : vector<1x32xf32>
    %25 = arith.negf %24 : vector<1x32xf32>
    %26 = math.exp %25 : vector<1x32xf32>
    %cst_11 = arith.constant 1.000000e+00 : f32
    %27 = vector.broadcast %cst_11 : f32 to vector<1x32xf32>
    %28 = arith.addf %27, %26 : vector<1x32xf32>
    %29 = arith.divf %27, %28 : vector<1x32xf32>
    %30 = vector.shape_cast %29 : vector<1x32xf32> to vector<1x32x1xf32>
    %31 = vector.broadcast %30 : vector<1x32x1xf32> to vector<1x32x16xf32>
    %32 = arith.mulf %31, %0 : vector<1x32x16xf32>
    %c0_12 = arith.constant 0 : index
    %c0_13 = arith.constant 0 : index
    %c0_14 = arith.constant 0 : index
    %33 = vector.load %arg4[%c0_12, %c0_13, %c0_14] : memref<1x32x16xf32, #tpu.memory_space<vmem>>, vector<1x32x16xf32>
    tpu.vector_store %arg4[%c0_12, %c0_13, %c0_14], %32 {strides = array<i32>} : memref<1x32x16xf32, #tpu.memory_space<vmem>>, vector<1x32x16xf32>,
    return
  }
  func.func @transform_0(%arg0: i32) -> (i32, i32, i32) {
    %c0_i32 = arith.constant 0 : i32
    %c0_i32_0 = arith.constant 0 : i32
    %c0_i32_1 = arith.constant 0 : i32
    return %arg0, %c0_i32, %c0_i32_0 : i32, i32, i32
  }
  func.func @transform_1(%arg0: i32) -> (i32, i32) {
    %c0_i32 = arith.constant 0 : i32
    %c0_i32_0 = arith.constant 0 : i32
    %c0_i32_1 = arith.constant 0 : i32
    return %c0_i32, %c0_i32_0 : i32, i32
  }
  func.func @transform_2(%arg0: i32) -> (i32, i32) {
    %c0_i32 = arith.constant 0 : i32
    %c0_i32_0 = arith.constant 0 : i32
    %c0_i32_1 = arith.constant 0 : i32
    return %c0_i32, %c0_i32_0 : i32, i32
  }
  func.func @transform_3(%arg0: i32) -> (i32, i32, i32) {
    %c0_i32 = arith.constant 0 : i32
    %c0_i32_0 = arith.constant 0 : i32
    %c0_i32_1 = arith.constant 0 : i32
    return %arg0, %c0_i32, %c0_i32_0 : i32, i32, i32
  }
}

</mosaic_0001>

<bundles_post_ra>
// kernel: tpu_custom_call.1
= control target key start
LH: loop header
LB: loop body
LE: loop exit
PB: predicated region body
PF: predicated region fallthrough
CT: control target
= control target key end

     0   :  { %s1414_s12 = smov 0   ;;  %s1858_s0 = inlined_call_operand.vmem [shape: f32[2,32,16], index: 0, kind: input, shape index: {}]   ;;  %s1859_s1 = inlined_call_operand.vmem [shape: f32[2,32], index: 1, kind: input, shape index: {}]   ;;  %s1860_s2 = inlined_call_operand.vmem [shape: f32[32,2], index: 2, kind: input, shape index: {}]   ;;  %s1861_s3 = inlined_call_operand.vmem [shape: f32[2,32,16], index: 3, kind: output, shape index: {}]  }
   0x1 LB: > { %s1335_s13 = sadd.s32 4294967295, %s1390_s12   ;;  %p1339_p0 = scmp.ge.s32.totalorder %s1390_s12, 1  ;;  %s1390_s12 = sphi %s1414_s12, %s13_s12  }
   0x2   : > { %p137_p1 = scmp.lt.s32.totalorder %s1390_s12, 3 }
   0x4   : > { %p138_p2 = pnand %p1339_p0, %p137_p1 }
   0x5   : > { %p161_p3 = scmp.lt.s32.totalorder (!%p138_p2), %s1335_s13, 1  ;;  %vm175_vm0 = vcmask (!%p138_p2), 130048   ;;  %v209_v3 = vlaneseq (!%p138_p2)  ;;  %v264_v23 = vld [vmem:[%s1860_s2] sm:$0xff] (!%p138_p2)  ;;  %v265_v39 = vld [vmem:[%s1860_s2 + $0x8] sm:$0xff] (!%p138_p2)  ;;  %v266_v48 = vld [vmem:[%s1860_s2 + $0x10] sm:$0xff] (!%p138_p2)  ;;  %vm220_vm1 = vcmask (!%p138_p2), 130112  }
   0x6   : > { %141 = sbr.rel (%p138_p2) target bundleno = 762 (0x2fa), region = 32  ;;  %v267_v57 = vld [vmem:[%s1860_s2 + $0x18] sm:$0xff] (!%p138_p2)  ;;  %vm227_vm2 = vcmask (!%p138_p2), 195712   ;;  %vm234_vm3 = vcmask (!%p138_p2), 261312   ;;  %vm261_vm4 = vcmask (!%p138_p2), 1040384   ;;  %vm303_vm5 = vcmask (!%p138_p2), 254976  }
   0x7   : > { %v210_v7 = vand.u32 (!%p138_p2), 127, %v209_v3  ;;  %v1442_v13 = vshrl.u32 (!%p138_p2), %v209_v3, 7  ;;  %vm1148_vm6 = vcmask (!%p138_p2), 1041409   ;;  %vm1150_vm7 = vcmask (!%p138_p2), 1042434  }
   0x8   : > { %vm1152_vm8 = vcmask (!%p138_p2), 1043459   ;;  %vm1154_vm9 = vcmask (!%p138_p2), 1044484   ;;  %vm1156_vm10 = vcmask (!%p138_p2), 1045509   ;;  %vm1158_vm11 = vcmask (!%p138_p2), 1046534  }
   0x9   : > { %v222_v10 = vadd.s32 (!%p138_p2), 4294967280, %v210_v7  ;;  %v1445_v14 = vsub.s32 (!%p138_p2), %v210_v7, %v1442_v13  ;;  %v229_v18 = vadd.s32 (!%p138_p2), 4294967272, %v210_v7  ;;  %v215_v19 = vadd.s32 (!%p138_p2), 4294967288, %v210_v7 }
   0xa   : > { %v1459_v22 = vsub.s32 (!%p138_p2), 1, %v1442_v13  ;;  %v1466_v25 = vsub.s32 (!%p138_p2), 2, %v1442_v13  ;;  %v1469_v26 = vsub.s32 (!%p138_p2), 0, %v1442_v13  ;;  %v339_v28 = vsub.s32 (!%p138_p2), 3, %v1442_v13 }
   0xb   : > { %v1448_v15 = vsub.s32 (!%p138_p2), %v222_v10, %v1442_v13  ;;  %v1453_v20 = vsub.s32 (!%p138_p2), %v229_v18, %v1442_v13  ;;  %v1456_v21 = vsub.s32 (!%p138_p2), %v215_v19, %v1442_v13  ;;  %v346_v30 = vsub.s32 (!%p138_p2), 4, %v1442_v13 }
   0xc   : > { %v326_v24 = vrot.slane (!%p138_p2), %v264_v23, %v1459_v22  ;;  %v333_v27 = vrot.slane (!%p138_p2), %v264_v23, %v1466_v25  ;;  %v319_v29 = vrot.slane (!%p138_p2), %v264_v23, %v1469_v26  ;;  %v340_v31 = vrot.slane (!%p138_p2), %v264_v23, %v339_v28 }
   0xd   : > { %s1863_s13 = smov (!%p161_p3, %s1335_s13), 1  ;;  %v353_v32 = vsub.s32 5, %v1442_v13  ;;  %v347_v33 = vrot.slane %v264_v23, %v346_v30  ;;  %v360_v34 = vsub.s32 6, %v1442_v13  ;;  %v367_v36 = vsub.s32 7, %v1442_v13 }
   0xe   : > { %s1350_s14 = sshll.u32 %s1863_s13, 5  ;;  %v375_v40 = vrot.slane %v265_v39, %v1469_v26  ;;  %v382_v41 = vrot.slane %v265_v39, %v1459_v22  ;;  %v389_v42 = vrot.slane %v265_v39, %v1466_v25  ;;  %v396_v43 = vrot.slane %v265_v39, %v339_v28 }
   0xf   : > { %s1430_s17 = scalar_lea.vmem %s1858_s0, %s1350_s14  ;;  %v354_v35 = vrot.slane %v264_v23, %v353_v32  ;;  %v361_v37 = vrot.slane %v264_v23, %v360_v34  ;;  %v368_v38 = vrot.slane %v264_v23, %v367_v36  ;;  %v403_v44 = vrot.slane %v265_v39, %v346_v30  ;;  %s170_s30 = scalar_lea.vmem %s1861_s3, %s1350_s14 }
  0x10   : > { %v173_v0 = vld [vmem:[%s1430_s17 + $0x10] sm:$0xff]  ;;  %v171_v1 = vld [vmem:[%s1430_s17] sm:$0xff]  ;;  %v174_v2 = vld [vmem:[%s1430_s17 + $0x18] sm:$0xff]  ;;  %v410_v45 = vrot.slane %v265_v39, %v353_v32  ;;  %v417_v46 = vrot.slane %v265_v39, %v360_v34  ;;  %v424_v47 = vrot.slane %v265_v39, %v367_v36  ;;  %v431_v49 = vrot.slane %v266_v48, %v1469_v26 }
  0x11   : > { %v182_v4 = vsel %vm175_vm0, %v173_v0, 0.0  ;;  %v176_v5 = vsel %vm175_vm0, %v171_v1, 0.0  ;;  %v172_v6 = vld [vmem:[%s1430_s17 + $0x8] sm:$0xff]  ;;  %v185_v8 = vsel %vm175_vm0, %v174_v2, 0.0  ;;  %v193_v12 = vsel %vm175_vm0, %v171_v1, -inf }
  0x12   : > { %183 = vadd.xlane.f32.xlu1 %v182_v4  ;;  %177 = vadd.xlane.f32.xlu0 %v176_v5  ;;  %v179_v9 = vsel %vm175_vm0, %v172_v6, 0.0  ;;  %v196_v11 = vsel %vm175_vm0, %v172_v6, -inf  ;;  %v199_v16 = vsel %vm175_vm0, %v173_v0, -inf  ;;  %v202_v17 = vsel %vm175_vm0, %v174_v2, -inf }
  0x13   : > { %v438_v50 = vrot.slane %v266_v48, %v1459_v22  ;;  %v445_v51 = vrot.slane %v266_v48, %v1466_v25  ;;  %v452_v52 = vrot.slane %v266_v48, %v339_v28  ;;  %v459_v53 = vrot.slane %v266_v48, %v346_v30 }
  0x14   : > { %v466_v54 = vrot.slane %v266_v48, %v353_v32  ;;  %v473_v55 = vrot.slane %v266_v48, %v360_v34  ;;  %v480_v56 = vrot.slane %v266_v48, %v367_v36  ;;  %v487_v58 = vrot.slane %v267_v57, %v1469_v26 }
  0x15   : > { %v494_v59 = vrot.slane %v267_v57, %v1459_v22  ;;  %v501_v60 = vrot.slane %v267_v57, %v1466_v25  ;;  %v508_v61 = vrot.slane %v267_v57, %v339_v28  ;;  %v515_v62 = vrot.slane %v267_v57, %v346_v30 }
  0x16   : > { %186 = vadd.xlane.f32.xlu1 %v185_v8  ;;  %180 = vadd.xlane.f32.xlu0 %v179_v9  ;;  %v522_v63 = vrot.slane %v267_v57, %v353_v32  ;;  %v529_v0 = vrot.slane %v267_v57, %v360_v34  ;;  %v536_v1 = vrot.slane %v267_v57, %v367_v36  ;;  %v1392_v10 = vmov 1966171168  }
  0x17   : > { %vm1160_vm12 = vcmask 1047559   ;;  %vm1219_vm13 = vcmask 15360  }
  0x1a   : > { %197 = vmax.xlane.f32.xlu1 %v196_v11  ;;  %194 = vmax.xlane.f32.xlu0 %v193_v12  ;;  %v270_v11 = vunpack.c.l.s4 %v1392_v10 }
  0x1c   : > { %v271_v28 = vunpack.c.0.s8 %v270_v11 }
  0x1e   : > { %200 = vmax.xlane.f32.xlu0 %v199_v16  ;;  %203 = vmax.xlane.f32.xlu1 %v202_v17 }
  0x2f   : > { %328 = vbcast.lane.b32.xlu1 %v326_v24, 256 }
  0x33   : > { %335 = vbcast.lane.b32.xlu1 %v333_v27, 256 }
  0x34   : > { %321 = vbcast.lane.b32.xlu0 %v319_v29, 256 }
  0x37   : > { %342 = vbcast.lane.b32.xlu1 %v340_v31, 256 }
  0x38   : > { %349 = vbcast.lane.b32.xlu0 %v347_v33, 256 }
  0x3b   : > { %356 = vbcast.lane.b32.xlu1 %v354_v35, 256  ;;  %v274_v35 = vsub.s32 %v271_v28, %v1442_v13 }
  0x3c   : > { %363 = vbcast.lane.b32.xlu0 %v361_v37, 256 }
  0x3f   : > { %370 = vbcast.lane.b32.xlu1 %v368_v38, 256 }
  0x40   : > { %377 = vbcast.lane.b32.xlu0 %v375_v40, 256 }
  0x43   : > { %384 = vbcast.lane.b32.xlu1 %v382_v41, 256  ;;  %v263_v41 = vld [vmem:[%s1859_s1] sm:$0x3] }
  0x44   : > { %391 = vbcast.lane.b32.xlu0 %v389_v42, 256 }
  0x47   : > { %398 = vbcast.lane.b32.xlu1 %v396_v43, 256 }
  0x48   : > { %405 = vbcast.lane.b32.xlu0 %v403_v44, 256 }
  0x4b   : > { %412 = vbcast.lane.b32.xlu1 %v410_v45, 256 }
  0x4c   : > { %419 = vbcast.lane.b32.xlu0 %v417_v46, 256  ;;  %v1393_v46 = vmov 0  }
  0x4d   : > { %1363 = vset.pattern.permute.xlu1 %v1393_v46  ;;  %1362 = vset.pattern.permute.xlu0 %v1393_v46 }
  0x4f   : > { %426 = vbcast.lane.b32.xlu1 %v424_v47, 256 }
  0x50   : > { %433 = vbcast.lane.b32.xlu0 %v431_v49, 256 }
  0x53   : > { %440 = vbcast.lane.b32.xlu1 %v438_v50, 256 }
  0x54   : > { %447 = vbcast.lane.b32.xlu0 %v445_v51, 256 }
  0x57   : > { %454 = vbcast.lane.b32.xlu1 %v452_v52, 256 }
  0x58   : > { %461 = vbcast.lane.b32.xlu0 %v459_v53, 256 }
  0x5b   : > { %468 = vbcast.lane.b32.xlu1 %v466_v54, 256 }
  0x5c   : > { %475 = vbcast.lane.b32.xlu0 %v473_v55, 256 }
  0x5f   : > { %482 = vbcast.lane.b32.xlu1 %v480_v56, 256 }
  0x60   : > { %489 = vbcast.lane.b32.xlu0 %v487_v58, 256 }
  0x63   : > { %496 = vbcast.lane.b32.xlu1 %v494_v59, 256 }
  0x64   : > { %503 = vbcast.lane.b32.xlu0 %v501_v60, 256 }
  0x67   : > { %510 = vbcast.lane.b32.xlu1 %v508_v61, 256 }
  0x68   : > { %517 = vbcast.lane.b32.xlu0 %v515_v62, 256 }
  0x6b   : > { %524 = vbcast.lane.b32.xlu1 %v522_v63, 256 }
  0x6c   : > { %531 = vbcast.lane.b32.xlu0 %v529_v0, 256 }
  0x6f   : > { %538 = vbcast.lane.b32.xlu1 %v536_v1, 256 }
  0x9f   : > { %v184_v2 = vpop.xlane.xlu1 %183  ;;  %v178_v3 = vpop.xlane.xlu0 %177 }
  0xa0   : > { %v189_v4 = vmul.f32 0.0625, %v178_v3  ;;  %v191_v5 = vmul.f32 0.0625, %v184_v2 }
  0xa2   : > { %v214_v12 = vrot.slane %v189_v4, %v1445_v14  ;;  %v226_v18 = vrot.slane %v191_v5, %v1448_v15 }
  0xa3   : > { %v187_v6 = vpop.xlane.xlu1 %186  ;;  %v181_v7 = vpop.xlane.xlu0 %180 }
  0xa4   : > { %v192_v8 = vmul.f32 0.0625, %v187_v6  ;;  %v190_v9 = vmul.f32 0.0625, %v181_v7 }
  0xa6   : > { %v233_v16 = vrot.slane %v192_v8, %v1453_v20  ;;  %v219_v17 = vrot.slane %v190_v9, %v1456_v21 }
  0xa7   : > { %v198_v19 = vpop.xlane.xlu1 %197  ;;  %v195_v22 = vpop.xlane.xlu0 %194 }
  0xa8   : > { %v221_v23 = vsel %vm220_vm1, %v219_v17, %v214_v12  ;;  %v248_v24 = vrot.slane %v198_v19, %v1456_v21  ;;  %v244_v25 = vrot.slane %v195_v22, %v1445_v14 }
  0xa9   : > { %v228_v27 = vsel %vm227_vm2, %v226_v18, %v221_v23 }
  0xaa   : > { %v235_v29 = vsel %vm234_vm3, %v233_v16, %v228_v27  ;;  %v249_v34 = vsel %vm220_vm1, %v248_v24, %v244_v25 }
  0xab   : > { %v201_v30 = vpop.xlane.xlu0 %200  ;;  %v204_v31 = vpop.xlane.xlu1 %203 }
  0xac   : > { %v253_v32 = vrot.slane %v201_v30, %v1448_v15  ;;  %v258_v33 = vrot.slane %v204_v31, %v1453_v20 }
  0xae   : > { %v254_v36 = vsel %vm227_vm2, %v253_v32, %v249_v34 }
  0xaf   : > { %v259_v21 = vsel %vm234_vm3, %v258_v33, %v254_v36  ;;  %v1514_v47 = vpop.permute.xlu0 %321  ;;  %v1530_v54 = vpop.permute.xlu1 %328 }
  0xb0   : > { %v262_v37 = vsel %vm261_vm4, %v235_v29, %v259_v21 }
  0xb1   : > { %v275_v38 = vrot.slane %v262_v37, %v274_v35 }
  0xb3   : > { %v283_v39 = vrot.slane %v275_v38, %v274_v35  ;;  %v276_v40 = vcombine.high %v275_v38, %v275_v38  ;;  %v1516_v48 = vpop.permute.xlu0 %349  ;;  %v1534_v56 = vpop.permute.xlu1 %335 }
  0xb5   : > { %v294_v15 = vrot.slane %v283_v39, %v1469_v26  ;;  %v290_v42 = vrot.slane %v276_v40, %v274_v35 }
  0xb7   : > { %v301_v20 = vmul.f32 %v294_v15, %v263_v41  ;;  %v298_v43 = vrot.slane %v290_v42, %v1469_v26  ;;  %v1518_v49 = vpop.permute.xlu0 %363  ;;  %v1538_v58 = vpop.permute.xlu1 %342 }
  0xb9   : > { %v304_v44 = vsel %vm303_vm5, %v301_v20, 0.0  ;;  %v302_v13 = vmul.f32 %v298_v43, %v263_v41 }
  0xba   : > { %305 = vadd.xlane.f32.xlu0 %v304_v44 }
  0xbb   : > { %v307_v45 = vsel %vm303_vm5, %v302_v13, 0.0  ;;  %v1520_v50 = vpop.permute.xlu0 %377  ;;  %v1542_v60 = vpop.permute.xlu1 %356 }
  0xbc   : > { %308 = vadd.xlane.f32.xlu1 %v307_v45 }
  0xbf   : > { %v1522_v51 = vpop.permute.xlu0 %391  ;;  %v1546_v62 = vpop.permute.xlu1 %370 }
  0xc3   : > { %v1524_v52 = vpop.permute.xlu0 %405  ;;  %v1550_v0 = vpop.permute.xlu1 %384 }
  0xc7   : > { %v1526_v26 = vpop.permute.xlu0 %419  ;;  %v1554_v2 = vpop.permute.xlu1 %398 }
  0xcb   : > { %v1528_v53 = vpop.permute.xlu0 %433  ;;  %v1558_v4 = vpop.permute.xlu1 %412 }
  0xcf   : > { %v1532_v55 = vpop.permute.xlu0 %447  ;;  %v1566_v9 = vpop.permute.xlu1 %426 }
  0xd3   : > { %v1536_v57 = vpop.permute.xlu0 %461  ;;  %v1574_v16 = vpop.permute.xlu1 %440 }
  0xd7   : > { %v1540_v59 = vpop.permute.xlu0 %475  ;;  %v1582_v22 = vpop.permute.xlu1 %454 }
  0xdb   : > { %v1544_v61 = vpop.permute.xlu0 %489  ;;  %v1590_v27 = vpop.permute.xlu1 %468 }
  0xdf   : > { %v1548_v63 = vpop.permute.xlu0 %503  ;;  %v1598_v31 = vpop.permute.xlu1 %482 }
  0xe3   : > { %v1552_v1 = vpop.permute.xlu0 %517  ;;  %v497_v35 = vpop.permute.xlu1 %496 }
  0xe7   : > { %v1556_v3 = vpop.permute.xlu0 %531  ;;  %v511_v38 = vpop.permute.xlu1 %510 }
  0xeb   : > { %v1618_v15 = vpop.permute.xlu1 %524 }
  0xef   : > { %v1625_v44 = vpop.permute.xlu1 %538 }
 0x147   : > { %v306_v5 = vpop.xlane.xlu0 %305 }
 0x148   : > { %v1560_v6 = vmax.f32 %v306_v5, 0.0 }
 0x14a   : > { %v572_v7 = vmul.f32 %v1514_v47, %v1560_v6  ;;  %v573_v8 = vmul.f32 %v1530_v54, %v1560_v6  ;;  %v574_v10 = vmul.f32 %v1534_v56, %v1560_v6  ;;  %v575_v11 = vmul.f32 %v1538_v58, %v1560_v6 }
 0x14b   : > { %v576_v12 = vmul.f32 %v1516_v48, %v1560_v6  ;;  %v577_v17 = vmul.f32 %v1542_v60, %v1560_v6  ;;  %v578_v18 = vmul.f32 %v1518_v49, %v1560_v6  ;;  %v579_v19 = vmul.f32 %v1546_v62, %v1560_v6 }
 0x14c   : > { %704 = vperm.xlu1 %1363, %v573_v8   ;;  %701 = vperm.xlu0 %1362, %v572_v7   ;;  %v580_v23 = vmul.f32 %v1520_v50, %v1560_v6  ;;  %v581_v24 = vmul.f32 %v1550_v0, %v1560_v6  ;;  %v582_v25 = vmul.f32 %v1522_v51, %v1560_v6  ;;  %v309_v7 = vpop.xlane.xlu1 %308 }
 0x14d   : > { %v583_v28 = vmul.f32 %v1554_v2, %v1560_v6  ;;  %v584_v29 = vmul.f32 %v1524_v52, %v1560_v6  ;;  %v585_v30 = vmul.f32 %v1558_v4, %v1560_v6  ;;  %v586_v32 = vmul.f32 %v1526_v26, %v1560_v6 }
 0x14e   : > { %v587_v33 = vmul.f32 %v1566_v9, %v1560_v6  ;;  %v588_v34 = vmul.f32 %v1528_v53, %v1560_v6  ;;  %v589_v36 = vmul.f32 %v1574_v16, %v1560_v6  ;;  %v590_v21 = vmul.f32 %v1532_v55, %v1560_v6 }
 0x14f   : > { %v591_v37 = vmul.f32 %v1582_v22, %v1560_v6  ;;  %v592_v39 = vmul.f32 %v1536_v57, %v1560_v6  ;;  %v593_v40 = vmul.f32 %v1590_v27, %v1560_v6  ;;  %v594_v41 = vmul.f32 %v1540_v59, %v1560_v6 }
 0x150   : > { %707 = vperm.xlu1 %1363, %v574_v10   ;;  %710 = vperm.xlu0 %1362, %v575_v11   ;;  %v595_v42 = vmul.f32 %v1598_v31, %v1560_v6  ;;  %v596_v20 = vmul.f32 %v1544_v61, %v1560_v6  ;;  %v597_v43 = vmul.f32 %v497_v35, %v1560_v6  ;;  %v1636_v10 = vmax.f32 %v309_v7, 0.0 }
 0x151   : > { %v598_v13 = vmul.f32 %v1548_v63, %v1560_v6  ;;  %v599_v45 = vmul.f32 %v511_v38, %v1560_v6  ;;  %v600_v46 = vmul.f32 %v1552_v1, %v1560_v6  ;;  %v601_v5 = vmul.f32 %v1618_v15, %v1560_v6 }
 0x152   : > { %v602_v8 = vmul.f32 %v1556_v3, %v1560_v6  ;;  %v603_v11 = vmul.f32 %v1625_v44, %v1560_v6  ;;  %v620_v6 = vmul.f32 %v1528_v53, %v1636_v10  ;;  %v622_v53 = vmul.f32 %v1532_v55, %v1636_v10 }
 0x153   : > { %v616_v55 = vmul.f32 %v1524_v52, %v1636_v10  ;;  %v633_v52 = vmul.f32 %v1618_v15, %v1636_v10 }
 0x154   : > { %713 = vperm.xlu1 %1363, %v576_v12   ;;  %716 = vperm.xlu0 %1362, %v577_v17   ;;  %v604_v12 = vmul.f32 %v1514_v47, %v1636_v10  ;;  %v605_v17 = vmul.f32 %v1530_v54, %v1636_v10  ;;  %v628_v47 = vmul.f32 %v1544_v61, %v1636_v10 }
 0x155   : > { %v629_v54 = vmul.f32 %v497_v35, %v1636_v10  ;;  %v607_v61 = vmul.f32 %v1538_v58, %v1636_v10  ;;  %v632_v58 = vmul.f32 %v1552_v1, %v1636_v10  ;;  %v610_v1 = vmul.f32 %v1518_v49, %v1636_v10 }
 0x156   : > { %v627_v49 = vmul.f32 %v1598_v31, %v1636_v10 }
 0x158   : > { %719 = vperm.xlu1 %1363, %v578_v18   ;;  %722 = vperm.xlu0 %1362, %v579_v19   ;;  %v612_v18 = vmul.f32 %v1520_v50, %v1636_v10  ;;  %v613_v19 = vmul.f32 %v1550_v0, %v1636_v10  ;;  %v606_v50 = vmul.f32 %v1534_v56, %v1636_v10 }
 0x159   : > { %v614_v0 = vmul.f32 %v1522_v51, %v1636_v10  ;;  %v623_v51 = vmul.f32 %v1582_v22, %v1636_v10  ;;  %v631_v56 = vmul.f32 %v511_v38, %v1636_v10  ;;  %v609_v22 = vmul.f32 %v1542_v60, %v1636_v10 }
 0x15a   : > { %v634_v60 = vmul.f32 %v1556_v3, %v1636_v10 }
 0x15c   : > { %725 = vperm.xlu1 %1363, %v580_v23   ;;  %728 = vperm.xlu0 %1362, %v581_v24   ;;  %v621_v23 = vmul.f32 %v1574_v16, %v1636_v10  ;;  %v630_v16 = vmul.f32 %v1548_v63, %v1636_v10  ;;  %v615_v24 = vmul.f32 %v1554_v2, %v1636_v10 }
 0x15d   : > { %v608_v63 = vmul.f32 %v1516_v48, %v1636_v10  ;;  %v624_v2 = vmul.f32 %v1536_v57, %v1636_v10  ;;  %v625_v48 = vmul.f32 %v1590_v27, %v1636_v10  ;;  %v618_v57 = vmul.f32 %v1526_v26, %v1636_v10 }
 0x15e   : > { %v611_v27 = vmul.f32 %v1546_v62, %v1636_v10  ;;  %v635_v26 = vmul.f32 %v1625_v44, %v1636_v10 }
 0x160   : > { %731 = vperm.xlu1 %1363, %v582_v25   ;;  %734 = vperm.xlu0 %1362, %v583_v28   ;;  %v617_v25 = vmul.f32 %v1558_v4, %v1636_v10  ;;  %v626_v4 = vmul.f32 %v1540_v59, %v1636_v10  ;;  %v619_v28 = vmul.f32 %v1566_v9, %v1636_v10 }
 0x164   : > { %737 = vperm.xlu1 %1363, %v584_v29   ;;  %740 = vperm.xlu0 %1362, %v585_v30  }
 0x168   : > { %743 = vperm.xlu1 %1363, %v586_v32   ;;  %746 = vperm.xlu0 %1362, %v587_v33  }
 0x16c   : > { %749 = vperm.xlu1 %1363, %v588_v34   ;;  %752 = vperm.xlu0 %1362, %v589_v36  }
 0x170   : > { %755 = vperm.xlu1 %1363, %v590_v21   ;;  %758 = vperm.xlu0 %1362, %v591_v37  }
 0x174   : > { %761 = vperm.xlu1 %1363, %v592_v39   ;;  %764 = vperm.xlu0 %1362, %v593_v40  }
 0x178   : > { %767 = vperm.xlu1 %1363, %v594_v41   ;;  %770 = vperm.xlu0 %1362, %v595_v42  }
 0x17c   : > { %773 = vperm.xlu1 %1363, %v596_v20   ;;  %776 = vperm.xlu0 %1362, %v597_v43  }
 0x180   : > { %779 = vperm.xlu1 %1363, %v598_v13   ;;  %782 = vperm.xlu0 %1362, %v599_v45  }
 0x184   : > { %785 = vperm.xlu1 %1363, %v600_v46   ;;  %788 = vperm.xlu0 %1362, %v601_v5  }
 0x188   : > { %791 = vperm.xlu1 %1363, %v602_v8   ;;  %794 = vperm.xlu0 %1362, %v603_v11  }
 0x18c   : > { %797 = vperm.xlu1 %1363, %v604_v12   ;;  %800 = vperm.xlu0 %1362, %v605_v17  }
 0x190   : > { %821 = vperm.xlu1 %1363, %v612_v18   ;;  %824 = vperm.xlu0 %1362, %v613_v19  }
 0x194   : > { %845 = vperm.xlu1 %1363, %v620_v6   ;;  %848 = vperm.xlu0 %1362, %v621_v23  }
 0x198   : > { %869 = vperm.xlu1 %1363, %v628_v47   ;;  %872 = vperm.xlu0 %1362, %v629_v54  }
 0x19c   : > { %803 = vperm.xlu1 %1363, %v606_v50   ;;  %827 = vperm.xlu0 %1362, %v614_v0  }
 0x1a0   : > { %851 = vperm.xlu1 %1363, %v622_v53   ;;  %875 = vperm.xlu0 %1362, %v630_v16  }
 0x1a4   : > { %806 = vperm.xlu1 %1363, %v607_v61   ;;  %830 = vperm.xlu0 %1362, %v615_v24  }
 0x1a8   : > { %854 = vperm.xlu1 %1363, %v623_v51   ;;  %878 = vperm.xlu0 %1362, %v631_v56  }
 0x1ac   : > { %833 = vperm.xlu1 %1363, %v616_v55   ;;  %809 = vperm.xlu0 %1362, %v608_v63  }
 0x1b0   : > { %881 = vperm.xlu1 %1363, %v632_v58   ;;  %857 = vperm.xlu0 %1362, %v624_v2  }
 0x1b4   : > { %812 = vperm.xlu1 %1363, %v609_v22   ;;  %836 = vperm.xlu0 %1362, %v617_v25  }
 0x1b8   : > { %860 = vperm.xlu1 %1363, %v625_v48   ;;  %884 = vperm.xlu0 %1362, %v633_v52  }
 0x1bc   : > { %839 = vperm.xlu1 %1363, %v618_v57   ;;  %815 = vperm.xlu0 %1362, %v610_v1  }
 0x1c0   : > { %887 = vperm.xlu1 %1363, %v634_v60   ;;  %863 = vperm.xlu0 %1362, %v626_v4  }
 0x1c4   : > { %818 = vperm.xlu1 %1363, %v611_v27   ;;  %842 = vperm.xlu0 %1362, %v619_v28  }
 0x1c8   : > { %866 = vperm.xlu1 %1363, %v627_v49   ;;  %890 = vperm.xlu0 %1362, %v635_v26  }
 0x1cb   : > { %v705_v3 = vpop.permute.xlu1 %704  ;;  %v702_v59 = vpop.permute.xlu0 %701 }
 0x1cc   : > { %v899_v34 = vrot.slane %v705_v3, %v1445_v14  ;;  %v895_v9 = vrot.slane %v702_v59, %v1445_v14 }
 0x1ce   : > { %v1149_v21 = vsel %vm1148_vm6, %v899_v34, %v895_v9 }
 0x1cf   : > { %v708_v29 = vpop.permute.xlu1 %707  ;;  %v711_v30 = vpop.permute.xlu0 %710 }
 0x1d0   : > { %v903_v31 = vrot.slane %v708_v29, %v1445_v14  ;;  %v907_v37 = vrot.slane %v711_v30, %v1445_v14 }
 0x1d2   : > { %v1151_v39 = vsel %vm1150_vm7, %v903_v31, %v1149_v21 }
 0x1d3   : > { %v714_v32 = vpop.permute.xlu1 %713  ;;  %v717_v33 = vpop.permute.xlu0 %716  ;;  %v1153_v20 = vsel %vm1152_vm8, %v907_v37, %v1151_v39 }
 0x1d4   : > { %v911_v40 = vrot.slane %v714_v32, %v1445_v14  ;;  %v915_v43 = vrot.slane %v717_v33, %v1445_v14 }
 0x1d6   : > { %v1155_v45 = vsel %vm1154_vm9, %v911_v40, %v1153_v20 }
 0x1d7   : > { %v720_v62 = vpop.permute.xlu1 %719  ;;  %v723_v35 = vpop.permute.xlu0 %722  ;;  %v1157_v11 = vsel %vm1156_vm10, %v915_v43, %v1155_v45 }
 0x1d8   : > { %v919_v46 = vrot.slane %v720_v62, %v1445_v14  ;;  %v923_v12 = vrot.slane %v723_v35, %v1445_v14 }
 0x1da   : > { %v1159_v23 = vsel %vm1158_vm11, %v919_v46, %v1157_v11 }
 0x1db   : > { %v726_v36 = vpop.permute.xlu1 %725  ;;  %v729_v38 = vpop.permute.xlu0 %728  ;;  %v1161_v53 = vsel %vm1160_vm12, %v923_v12, %v1159_v23 }
 0x1dc   : > { %v927_v41 = vrot.slane %v726_v36, %v1445_v14  ;;  %v931_v15 = vrot.slane %v729_v38, %v1445_v14  ;;  %v1220_v56 = vsel %vm1219_vm13, %v1161_v53, 0.0 }
 0x1de   : > { %v1162_v5 = vsel %vm1148_vm6, %v931_v15, %v927_v41 }
 0x1df   : > { %v732_v42 = vpop.permute.xlu1 %731  ;;  %v735_v13 = vpop.permute.xlu0 %734 }
 0x1e0   : > { %v935_v44 = vrot.slane %v732_v42, %v1445_v14  ;;  %v939_v7 = vrot.slane %v735_v13, %v1445_v14 }
 0x1e2   : > { %v1163_v8 = vsel %vm1150_vm7, %v935_v44, %v1162_v5 }
 0x1e3   : > { %v738_v10 = vpop.permute.xlu1 %737  ;;  %v741_v18 = vpop.permute.xlu0 %740  ;;  %v1164_v19 = vsel %vm1152_vm8, %v939_v7, %v1163_v8 }
 0x1e4   : > { %v943_v17 = vrot.slane %v738_v10, %v1445_v14  ;;  %v947_v6 = vrot.slane %v741_v18, %v1445_v14 }
 0x1e6   : > { %v1165_v47 = vsel %vm1154_vm9, %v943_v17, %v1164_v19 }
 0x1e7   : > { %v744_v54 = vpop.permute.xlu1 %743  ;;  %v747_v0 = vpop.permute.xlu0 %746  ;;  %v1166_v16 = vsel %vm1156_vm10, %v947_v6, %v1165_v47 }
 0x1e8   : > { %v951_v50 = vrot.slane %v744_v54, %v1445_v14  ;;  %v955_v61 = vrot.slane %v747_v0, %v1445_v14 }
 0x1ea   : > { %v1167_v24 = vsel %vm1158_vm11, %v951_v50, %v1166_v16 }
 0x1eb   : > { %v750_v51 = vpop.permute.xlu1 %749  ;;  %v1168_v55 = vsel %vm1160_vm12, %v955_v61, %v1167_v24  ;;  %v753_v63 = vpop.permute.xlu0 %752 }
 0x1ec   : > { %1221 = vadd.xlane.f32.xlu1 %v1220_v56  ;;  %v1223_v58 = vsel %vm1219_vm13, %v1168_v55, 0.0  ;;  %v959_v2 = vrot.slane %v750_v51, %v1445_v14  ;;  %v963_v22 = vrot.slane %v753_v63, %v1445_v14 }
 0x1ed   : > { %1224 = vadd.xlane.f32.xlu0 %v1223_v58 }
 0x1ee   : > { %v1169_v57 = vsel %vm1148_vm6, %v963_v22, %v959_v2 }
 0x1ef   : > { %v756_v25 = vpop.permute.xlu1 %755  ;;  %v759_v52 = vpop.permute.xlu0 %758 }
 0x1f0   : > { %v967_v48 = vrot.slane %v756_v25, %v1445_v14  ;;  %v971_v1 = vrot.slane %v759_v52, %v1445_v14 }
 0x1f2   : > { %v1170_v60 = vsel %vm1150_vm7, %v967_v48, %v1169_v57 }
 0x1f3   : > { %v762_v4 = vpop.permute.xlu1 %761  ;;  %v765_v28 = vpop.permute.xlu0 %764  ;;  %v1171_v49 = vsel %vm1152_vm8, %v971_v1, %v1170_v60 }
 0x1f4   : > { %v975_v27 = vrot.slane %v762_v4, %v1445_v14  ;;  %v979_v26 = vrot.slane %v765_v28, %v1445_v14 }
 0x1f6   : > { %v1172_v3 = vsel %vm1154_vm9, %v975_v27, %v1171_v49 }
 0x1f7   : > { %v768_v59 = vpop.permute.xlu1 %767  ;;  %v771_v30 = vpop.permute.xlu0 %770  ;;  %v1173_v32 = vsel %vm1156_vm10, %v979_v26, %v1172_v3 }
 0x1f8   : > { %v983_v29 = vrot.slane %v768_v59, %v1445_v14  ;;  %v987_v33 = vrot.slane %v771_v30, %v1445_v14 }
 0x1fa   : > { %v1174_v62 = vsel %vm1158_vm11, %v983_v29, %v1173_v32 }
 0x1fb   : > { %v774_v34 = vpop.permute.xlu1 %773  ;;  %v1175_v9 = vsel %vm1160_vm12, %v987_v33, %v1174_v62  ;;  %v777_v35 = vpop.permute.xlu0 %776 }
 0x1fc   : > { %v1226_v31 = vsel %vm1219_vm13, %v1175_v9, 0.0  ;;  %v991_v36 = vrot.slane %v774_v34, %v1445_v14  ;;  %v995_v21 = vrot.slane %v777_v35, %v1445_v14 }
 0x1fd   : > { %1227 = vadd.xlane.f32.xlu0 %v1226_v31 }
 0x1fe   : > { %v1176_v40 = vsel %vm1148_vm6, %v995_v21, %v991_v36 }
 0x1ff   : > { %v780_v37 = vpop.permute.xlu1 %779  ;;  %v783_v39 = vpop.permute.xlu0 %782 }
 0x200   : > { %v999_v38 = vrot.slane %v780_v37, %v1445_v14  ;;  %v1003_v41 = vrot.slane %v783_v39, %v1445_v14 }
 0x202   : > { %v1177_v15 = vsel %vm1150_vm7, %v999_v38, %v1176_v40 }
 0x203   : > { %v786_v42 = vpop.permute.xlu1 %785  ;;  %v789_v43 = vpop.permute.xlu0 %788  ;;  %v1178_v44 = vsel %vm1152_vm8, %v1003_v41, %v1177_v15 }
 0x204   : > { %v1007_v20 = vrot.slane %v786_v42, %v1445_v14  ;;  %v1011_v13 = vrot.slane %v789_v43, %v1445_v14 }
 0x206   : > { %v1179_v45 = vsel %vm1154_vm9, %v1007_v20, %v1178_v44 }
 0x207   : > { %v792_v46 = vpop.permute.xlu1 %791  ;;  %v795_v7 = vpop.permute.xlu0 %794  ;;  %v1180_v8 = vsel %vm1156_vm10, %v1011_v13, %v1179_v45 }
 0x208   : > { %v1015_v5 = vrot.slane %v792_v46, %v1445_v14  ;;  %v1019_v10 = vrot.slane %v795_v7, %v1445_v14 }
 0x20a   : > { %v1181_v11 = vsel %vm1158_vm11, %v1015_v5, %v1180_v8 }
 0x20b   : > { %v798_v12 = vpop.permute.xlu1 %797  ;;  %v1182_v17 = vsel %vm1160_vm12, %v1019_v10, %v1181_v11  ;;  %v801_v18 = vpop.permute.xlu0 %800 }
 0x20c   : > { %v1229_v19 = vsel %vm1219_vm13, %v1182_v17, 0.0  ;;  %v1023_v60 = vrot.slane %v798_v12, %v1445_v14  ;;  %v1027_v4 = vrot.slane %v801_v18, %v1445_v14 }
 0x20d   : > { %1230 = vadd.xlane.f32.xlu0 %v1229_v19 }
 0x20e   : > { %v1183_v35 = vsel %vm1148_vm6, %v1027_v4, %v1023_v60 }
 0x20f   : > { %v822_v6 = vpop.permute.xlu1 %821  ;;  %v825_v23 = vpop.permute.xlu0 %824 }
 0x210   : > { %v1055_v27 = vrot.slane %v822_v6, %v1445_v14  ;;  %v1059_v28 = vrot.slane %v825_v23, %v1445_v14 }
 0x212   : > { %v1190_v31 = vsel %vm1148_vm6, %v1059_v28, %v1055_v27 }
 0x213   : > { %v846_v47 = vpop.permute.xlu1 %845  ;;  %v849_v54 = vpop.permute.xlu0 %848 }
 0x214   : > { %v1087_v49 = vrot.slane %v846_v47, %v1445_v14  ;;  %v1091_v26 = vrot.slane %v849_v54, %v1445_v14 }
 0x216   : > { %v1197_v21 = vsel %vm1148_vm6, %v1091_v26, %v1087_v49 }
 0x217   : > { %v870_v50 = vpop.permute.xlu1 %869  ;;  %v873_v0 = vpop.permute.xlu0 %872 }
 0x218   : > { %v1119_v3 = vrot.slane %v870_v50, %v1445_v14  ;;  %v1123_v59 = vrot.slane %v873_v0, %v1445_v14 }
 0x21a   : > { %v1204_v37 = vsel %vm1148_vm6, %v1123_v59, %v1119_v3 }
 0x21b   : > { %v804_v53 = vpop.permute.xlu1 %803  ;;  %v828_v16 = vpop.permute.xlu0 %827 }
 0x21c   : > { %v1031_v30 = vrot.slane %v804_v53, %v1445_v14  ;;  %v1063_v32 = vrot.slane %v828_v16, %v1445_v14 }
 0x21e   : > { %v1184_v41 = vsel %vm1150_vm7, %v1031_v30, %v1183_v35  ;;  %v1191_v15 = vsel %vm1150_vm7, %v1063_v32, %v1190_v31 }
 0x21f   : > { %v852_v61 = vpop.permute.xlu1 %851  ;;  %v876_v24 = vpop.permute.xlu0 %875 }
 0x220   : > { %v1095_v62 = vrot.slane %v852_v61, %v1445_v14  ;;  %v1127_v34 = vrot.slane %v876_v24, %v1445_v14 }
 0x222   : > { %v1198_v44 = vsel %vm1150_vm7, %v1095_v62, %v1197_v21  ;;  %v1205_v13 = vsel %vm1150_vm7, %v1127_v34, %v1204_v37 }
 0x223   : > { %v807_v51 = vpop.permute.xlu1 %806  ;;  %v831_v56 = vpop.permute.xlu0 %830 }
 0x224   : > { %v1035_v9 = vrot.slane %v807_v51, %v1445_v14  ;;  %v1067_v36 = vrot.slane %v831_v56, %v1445_v14 }
 0x226   : > { %v1185_v45 = vsel %vm1152_vm8, %v1035_v9, %v1184_v41  ;;  %v1192_v5 = vsel %vm1152_vm8, %v1067_v36, %v1191_v15 }
 0x227   : > { %v855_v55 = vpop.permute.xlu1 %854  ;;  %v1766_v63 = vpop.permute.xlu0 %878 }
 0x228   : > { %v1099_v7 = vrot.slane %v855_v55, %v1445_v14  ;;  %v1131_v8 = vrot.slane %v1766_v63, %v1445_v14 }
 0x22a   : > { %v1199_v24 = vsel %vm1152_vm8, %v1099_v7, %v1198_v44  ;;  %v1206_v63 = vsel %vm1152_vm8, %v1131_v8, %v1205_v13  ;;  %v1380_v8 = vld [vmem:[%s1430_s17] sm:$0xff] }
 0x22b   : > { %v834_v58 = vpop.permute.xlu1 %833  ;;  %v810_v2 = vpop.permute.xlu0 %809 }
 0x22c   : > { %v1071_v38 = vrot.slane %v834_v58, %v1445_v14  ;;  %v1039_v39 = vrot.slane %v810_v2, %v1445_v14 }
 0x22e   : > { %v1193_v11 = vsel %vm1154_vm9, %v1071_v38, %v1192_v5  ;;  %v1186_v12 = vsel %vm1154_vm9, %v1039_v39, %v1185_v45 }
 0x22f   : > { %v1768_v22 = vpop.permute.xlu1 %881  ;;  %v858_v25 = vpop.permute.xlu0 %857 }
 0x230   : > { %v1135_v17 = vrot.slane %v1768_v22, %v1445_v14  ;;  %v1103_v18 = vrot.slane %v858_v25, %v1445_v14 }
 0x232   : > { %v1200_v58 = vsel %vm1154_vm9, %v1103_v18, %v1199_v24 }
 0x233   : > { %v813_v48 = vpop.permute.xlu1 %812  ;;  %v837_v52 = vpop.permute.xlu0 %836 }
 0x234   : > { %v1043_v42 = vrot.slane %v813_v48, %v1445_v14  ;;  %v1075_v20 = vrot.slane %v837_v52, %v1445_v14  ;;  %v1207_v48 = vsel %vm1154_vm9, %v1135_v17, %v1206_v63 }
 0x236   : > { %v1187_v6 = vsel %vm1156_vm10, %v1043_v42, %v1186_v12  ;;  %v1194_v23 = vsel %vm1156_vm10, %v1075_v20, %v1193_v11  ;;  %v1381_v11 = vld [vmem:[%s1430_s17 + $0x8] sm:$0xff] }
 0x237   : > { %v1770_v57 = vpop.permute.xlu1 %860  ;;  %v1772_v1 = vpop.permute.xlu0 %884 }
 0x238   : > { %v1107_v47 = vrot.slane %v1770_v57, %v1445_v14  ;;  %v1139_v0 = vrot.slane %v1772_v1, %v1445_v14 }
 0x23a   : > { %v1201_v52 = vsel %vm1156_vm10, %v1107_v47, %v1200_v58  ;;  %v1208_v4 = vsel %vm1156_vm10, %v1139_v0, %v1207_v48 }
 0x23b   : > { %v840_v29 = vpop.permute.xlu1 %839  ;;  %v816_v33 = vpop.permute.xlu0 %815 }
 0x23c   : > { %v1047_v46 = vrot.slane %v816_v33, %v1445_v14  ;;  %v1079_v10 = vrot.slane %v840_v29, %v1445_v14 }
 0x23e   : > { %v1188_v61 = vsel %vm1158_vm11, %v1047_v46, %v1187_v6  ;;  %v1195_v55 = vsel %vm1158_vm11, %v1079_v10, %v1194_v23  ;;  %v1383_v23 = vld [vmem:[%s1430_s17 + $0x18] sm:$0xff] }
 0x23f   : > { %v888_v40 = vpop.permute.xlu1 %887  ;;  %v864_v43 = vpop.permute.xlu0 %863 }
 0x240   : > { %v1111_v53 = vrot.slane %v864_v43, %v1445_v14  ;;  %v1143_v51 = vrot.slane %v888_v40, %v1445_v14 }
 0x242   : > { %v1202_v28 = vsel %vm1158_vm11, %v1111_v53, %v1201_v52  ;;  %v1209_v26 = vsel %vm1158_vm11, %v1143_v51, %v1208_v4 }
 0x243   : > { %v819_v19 = vpop.permute.xlu1 %818  ;;  %v843_v50 = vpop.permute.xlu0 %842 }
 0x244   : > { %v1051_v54 = vrot.slane %v819_v19, %v1445_v14  ;;  %v1083_v16 = vrot.slane %v843_v50, %v1445_v14  ;;  %v1382_v19 = vld [vmem:[%s1430_s17 + $0x10] sm:$0xff] }
 0x246   : > { %v1189_v56 = vsel %vm1160_vm12, %v1051_v54, %v1188_v61  ;;  %v1196_v25 = vsel %vm1160_vm12, %v1083_v16, %v1195_v55 }
 0x247   : > { %v867_v2 = vpop.permute.xlu1 %866  ;;  %v1232_v22 = vsel %vm1219_vm13, %v1189_v56, 0.0  ;;  %v891_v1 = vpop.permute.xlu0 %890  ;;  %v1235_v60 = vsel %vm1219_vm13, %v1196_v25, 0.0 }
 0x248   : > { %v1115_v57 = vrot.slane %v867_v2, %v1445_v14  ;;  %1233 = vadd.xlane.f32.xlu1 %v1232_v22  ;;  %v1147_v27 = vrot.slane %v891_v1, %v1445_v14  ;;  %1236 = vadd.xlane.f32.xlu0 %v1235_v60 }
 0x24a   : > { %v1203_v49 = vsel %vm1160_vm12, %v1115_v57, %v1202_v28  ;;  %v1210_v59 = vsel %vm1160_vm12, %v1147_v27, %v1209_v26 }
 0x24b   : > { %v1238_v3 = vsel %vm1219_vm13, %v1203_v49, 0.0  ;;  %v1241_v29 = vsel %vm1219_vm13, %v1210_v59, 0.0 }
 0x24c   : > { %1239 = vadd.xlane.f32.xlu1 %v1238_v3  ;;  %1242 = vadd.xlane.f32.xlu0 %v1241_v29 }
 0x279   : > { %v1222_v33 = vpop.xlane.xlu1 %1221 }
 0x27a   : > { %v1225_v30 = vpop.xlane.xlu0 %1224 }
 0x28a   : > { %v1228_v32 = vpop.xlane.xlu0 %1227 }
 0x29a   : > { %v1231_v62 = vpop.xlane.xlu0 %1230 }
 0x2d5   : > { %v1234_v14 = vpop.xlane.xlu1 %1233  ;;  %v1237_v9 = vpop.xlane.xlu0 %1236 }
 0x2d6   : > { %v1244_v34 = vadd.f32 %v1234_v14, %v1222_v33  ;;  %v1245_v35 = vadd.f32 %v1237_v9, %v1225_v30 }
 0x2d8   : > { %v1344_v31 = vmul.f32 -1.442695, %v1244_v34  ;;  %v1345_v36 = vmul.f32 -1.442695, %v1245_v35 }
 0x2d9   : > { %v1240_v21 = vpop.xlane.xlu1 %1239  ;;  %v1243_v38 = vpop.xlane.xlu0 %1242 }
 0x2da   : > { %1364 = vpow2.f32 %v1344_v31  ;;  %v1246_v37 = vadd.f32 %v1240_v21, %v1228_v32  ;;  %v1247_v39 = vadd.f32 %v1243_v38, %v1231_v62 }
 0x2db   : > { %1366 = vpow2.f32 %v1345_v36 }
 0x2dc   : > { %v1346_v40 = vmul.f32 -1.442695, %v1246_v37  ;;  %v1347_v41 = vmul.f32 -1.442695, %v1247_v39 }
 0x2de   : > { %1368 = vpow2.f32 %v1346_v40 }
 0x2df   : > { %1370 = vpow2.f32 %v1347_v41 }
 0x2e4   : > { %v1365_v15 = vpop.eup %1364 }
 0x2e5   : > { %v1367_v42 = vpop.eup %1366  ;;  %v1260_v20 = vadd.f32 1.0, %v1365_v15 }
 0x2e6   : > { %v1261_v43 = vadd.f32 1.0, %v1367_v42 }
 0x2e7   : > { %1372 = vrcp.f32 %v1260_v20 }
 0x2e8   : > { %v1369_v44 = vpop.eup %1368  ;;  %1374 = vrcp.f32 %v1261_v43 }
 0x2e9   : > { %v1371_v13 = vpop.eup %1370  ;;  %v1262_v45 = vadd.f32 1.0, %v1369_v44 }
 0x2ea   : > { %v1263_v46 = vadd.f32 1.0, %v1371_v13 }
 0x2eb   : > { %1376 = vrcp.f32 %v1262_v45 }
 0x2ec   : > { %1378 = vrcp.f32 %v1263_v46 }
 0x2f1   : > { %v1373_v5 = vpop.eup %1372 }
 0x2f2   : > { %v1375_v7 = vpop.eup %1374  ;;  %v1272_v10 = vmul.f32 %v1380_v8, %v1373_v5 }
 0x2f3   : > { %v1273_v12 = vmul.f32 %v1381_v11, %v1375_v7 }
 0x2f4   : > { %1276 = vst.msk [vmem:[%s170_s30] sm:$0xff] %vm175_vm0, %v1272_v10 }
 0x2f5   : > { %v1377_v17 = vpop.eup %1376  ;;  %1277 = vst.msk [vmem:[%s170_s30 + $0x8] sm:$0xff] %vm175_vm0, %v1273_v12 }
 0x2f6   : > { %v1379_v18 = vpop.eup %1378  ;;  %v1274_v6 = vmul.f32 %v1382_v19, %v1377_v17 }
 0x2f7   : > { %v1275_v47 = vmul.f32 %v1383_v23, %v1379_v18 }
 0x2f8   : > { %1278 = vst.msk [vmem:[%s170_s30 + $0x10] sm:$0xff] %vm175_vm0, %v1274_v6 }
 0x2f9   : > { %1279 = vst.msk [vmem:[%s170_s30 + $0x18] sm:$0xff] %vm175_vm0, %v1275_v47 }
 0x2fa PF: > { %s13_s12 = sadd.s32 1, %s1390_s12  }
 0x2fb   : > { %p10_p4 = scmp.ge.s32.totalorder %s13_s12, 4  }
 0x2fd   :  { %12 = sbr.rel (!%p10_p4) target bundleno = 1 (0x1), region = 62 }

</bundles_post_ra>
